<compile_context>
chip_gen: v6e
topology: v6e:2x2x1
jax: 0.10.0
libtpu: 0.0.40
codegen_flags: <defaults>
</compile_context>

<pallas_src>
import jax
import jax.numpy as jnp
from jax import lax
from jax.experimental import pallas as pl
from jax.experimental.pallas import tpu as pltpu

DIM = 10      # hidden dim from the module
LANES = 128   # batch rows are laid out on lanes in the kernel output


def _round_up(x, m):
    return ((x + m - 1) // m) * m


def linear_model_kernel(x_ref, w1t_ref, w2_ref, o_ref):
    # fc1 (no bias) on the MXU, f32 accumulation.
    h = jnp.dot(x_ref[...], w1t_ref[...], preferred_element_type=jnp.float32)
    # ReLU on the VPU.
    h = jnp.maximum(h, 0.0)
    # fc2 (no bias), batch-on-lanes: contract both operands' last (feature)
    # dims -- the standard A @ B.T MXU pattern -- so the result is (1, tb)
    # with the batch dimension already on lanes.  Lane-dense store, no
    # in-kernel relayout needed.
    out = lax.dot_general(
        w2_ref[...], h,                                  # (1, D) x (tb, D)
        dimension_numbers=(((1,), (1,)), ((), ())),
        preferred_element_type=jnp.float32,
    )                                                    # -> (1, tb)
    o_ref[...] = out.astype(o_ref.dtype)


def linear_model_forward(x, w1, w2, *, tile_b=8192, min_kernel_batch=2048,
                         force_kernel=False):
    """Forward pass of LinearModel.

    x:  [B, DIM] float32
    w1: [DIM, DIM] fc1.weight in nn.Linear layout ([out_features, in_features])
    w2: [1, DIM]   fc2.weight in nn.Linear layout
    returns [B, 1]
    """
    B, D = x.shape
    assert w1.shape == (D, D) and w2.shape == (1, D)

    # Small batches: kernel launch + per-step overhead dominates -> plain jnp.
    if B < min_kernel_batch and not force_kernel:
        h = jnp.maximum(x @ w1.T, 0.0)
        return h @ w2.T

    w1_t = w1.T.astype(x.dtype)   # [in, out] so the kernel computes x @ W1^T
    w2 = w2.astype(x.dtype)

    # Tiling: pad the batch only to the 128-lane quantum, pick n_steps >= 2
    # (so the "parallel" axis feeds both v7x TensorCores), and derive the row
    # tile from cdiv so padding waste stays small.
    Bq = _round_up(B, LANES)
    n_steps = max(pl.cdiv(Bq, tile_b), 2)
    tb = _round_up(pl.cdiv(Bq, n_steps), LANES)
    Bp = n_steps * tb
    if Bp != B:
        x = jnp.pad(x, ((0, Bp - B), (0, 0)))   # zero rows -> zero outputs, sliced off

    out = pl.pallas_call(
        linear_model_kernel,
        # Batch-on-lanes output: (1, Bp) in HBM = 4 bytes/row of writeback.
        out_shape=jax.ShapeDtypeStruct((1, Bp), jnp.float32),
        grid=(n_steps,),
        in_specs=[
            # x: streamed tile-by-tile over the batch grid axis (double-buffered).
            pl.BlockSpec((tb, D), lambda i: (i, 0)),
            # weights: constant index_map -> resident in VMEM across all steps.
            pl.BlockSpec((D, D), lambda i: (0, 0)),
            pl.BlockSpec((1, D), lambda i: (0, 0)),
        ],
        out_specs=pl.BlockSpec((1, tb), lambda i: (0, i)),
        compiler_params=pltpu.CompilerParams(
            dimension_semantics=("parallel",),
        ),
    )(x, w1_t, w2)

    # Strip batch padding; row-major order is preserved so this is free.
    return out[0, :B].reshape(B, 1).astype(x.dtype)


if __name__ == "__main__":
    key = jax.random.PRNGKey(0)
    k_x, k_w1, k_w2 = jax.random.split(key, 3)

    # Deterministic parameter init (uniform, kaiming-style bound 1/sqrt(fan_in)).
    # nn.Linear weight layouts: fc1.weight [10, 10], fc2.weight [1, 10].
    bound = 1.0 / (DIM ** 0.5)
    w1 = jax.random.uniform(k_w1, (DIM, DIM), jnp.float32, -bound, bound)
    w2 = jax.random.uniform(k_w2, (1, DIM), jnp.float32, -bound, bound)

    def reference(xv):
        h = jnp.maximum(jnp.dot(xv, w1.T, precision=lax.Precision.HIGHEST), 0.0)
        return jnp.dot(h, w2.T, precision=lax.Precision.HIGHEST)

    # Exercise the Pallas path at a few batch sizes, including a
    # non-multiple-of-128 batch and a multi-tile batch.
    for batch in (8, 1040, 4096):
        x = jax.random.normal(k_x, (batch, DIM), jnp.float32)
        out = jax.block_until_ready(
            linear_model_forward(x, w1, w2, force_kernel=True))
        ref = reference(x)
        assert out.shape == (batch, 1), (out.shape, batch)
        assert jnp.allclose(out, ref, atol=1e-4, rtol=1e-4), (
            f"mismatch at batch={batch}")

    # Small-batch path dispatches to plain jnp (kernel overhead cannot win there).
    x_small = jax.random.normal(k_x, (8, DIM), jnp.float32)
    out_small = jax.block_until_ready(linear_model_forward(x_small, w1, w2))
    assert out_small.shape == (8, 1)
    assert jnp.allclose(out_small, reference(x_small), atol=1e-4, rtol=1e-4)

    print("KERNEL_OK")
</pallas_src>

<mosaic_0001>
module attributes {stable_mosaic.version = 11 : i64} {
  func.func @linear_model_kernel(%arg0: i32, %arg1: memref<128x10xf32, #tpu.memory_space<vmem>>, %arg2: memref<10x10xf32, #tpu.memory_space<vmem>>, %arg3: memref<1x10xf32, #tpu.memory_space<vmem>>, %arg4: memref<1x128xf32, #tpu.memory_space<vmem>>) attributes {dimension_semantics = [#tpu.dimension_semantics<parallel>], iteration_bounds = array<i64: 2>, scalar_prefetch = 0 : i64, scratch_operands = 0 : i64, tpu.core_type = #tpu.core_type<tc>, window_params = [{transform_indices = @transform_0, window_bounds = array<i64: 128, 10>}, {pipeline_mode = #tpu.pipeline_mode<synchronous>, transform_indices = @transform_1, window_bounds = array<i64: 10, 10>}, {pipeline_mode = #tpu.pipeline_mode<synchronous>, transform_indices = @transform_2, window_bounds = array<i64: 1, 10>}, {transform_indices = @transform_3, window_bounds = array<i64: 1, 128>}]} {
    %c0 = arith.constant 0 : index
    %c0_0 = arith.constant 0 : index
    %0 = vector.load %arg1[%c0, %c0_0] : memref<128x10xf32, #tpu.memory_space<vmem>>, vector<128x10xf32>
    %c0_1 = arith.constant 0 : index
    %c0_2 = arith.constant 0 : index
    %1 = vector.load %arg2[%c0_1, %c0_2] : memref<10x10xf32, #tpu.memory_space<vmem>>, vector<10x10xf32>
    %cst = arith.constant dense<0.000000e+00> : vector<128x10xf32>
    %2 = tpu.matmul %0, %1, %cst {dimension_numbers = #tpu.dot_dimension_numbers<[1], [0], [0], [1], [0, 0, 1, 1], [], []>} : vector<128x10xf32>, vector<10x10xf32>, vector<128x10xf32> -> vector<128x10xf32>
    %cst_3 = arith.constant 0.000000e+00 : f32
    %3 = vector.broadcast %cst_3 : f32 to vector<128x10xf32>
    %4 = arith.maximumf %2, %3 : vector<128x10xf32>
    %c0_4 = arith.constant 0 : index
    %c0_5 = arith.constant 0 : index
    %5 = vector.load %arg3[%c0_4, %c0_5] : memref<1x10xf32, #tpu.memory_space<vmem>>, vector<1x10xf32>
    %cst_6 = arith.constant dense<0.000000e+00> : vector<1x128xf32>
    %6 = tpu.matmul %5, %4, %cst_6 {dimension_numbers = #tpu.dot_dimension_numbers<[1], [1], [0], [0], [0, 0, 1, 0], [], []>} : vector<1x10xf32>, vector<128x10xf32>, vector<1x128xf32> -> vector<1x128xf32>
    %c0_7 = arith.constant 0 : index
    %c0_8 = arith.constant 0 : index
    %7 = vector.load %arg4[%c0_7, %c0_8] : memref<1x128xf32, #tpu.memory_space<vmem>>, vector<1x128xf32>
    tpu.vector_store %arg4[%c0_7, %c0_8], %6 {strides = array<i32>} : memref<1x128xf32, #tpu.memory_space<vmem>>, vector<1x128xf32>,
    return
  }
  func.func @transform_0(%arg0: i32) -> (i32, i32) {
    %c0_i32 = arith.constant 0 : i32
    %c0_i32_0 = arith.constant 0 : i32
    return %arg0, %c0_i32 : i32, i32
  }
  func.func @transform_1(%arg0: i32) -> (i32, i32) {
    %c0_i32 = arith.constant 0 : i32
    %c0_i32_0 = arith.constant 0 : i32
    %c0_i32_1 = arith.constant 0 : i32
    return %c0_i32, %c0_i32_0 : i32, i32
  }
  func.func @transform_2(%arg0: i32) -> (i32, i32) {
    %c0_i32 = arith.constant 0 : i32
    %c0_i32_0 = arith.constant 0 : i32
    %c0_i32_1 = arith.constant 0 : i32
    return %c0_i32, %c0_i32_0 : i32, i32
  }
  func.func @transform_3(%arg0: i32) -> (i32, i32) {
    %c0_i32 = arith.constant 0 : i32
    %c0_i32_0 = arith.constant 0 : i32
    return %c0_i32, %arg0 : i32, i32
  }
}

</mosaic_0001>

<bundles_post_ra>
// kernel: tpu_custom_call.1
= control target key start
LH: loop header
LB: loop body
LE: loop exit
PB: predicated region body
PF: predicated region fallthrough
CT: control target
= control target key end

     0   :  { %8 = vsyncpa [#allocation3], 0  ;;  %s1035_s0 = inlined_call_operand.vmem [shape: f32[256,10], index: 0, kind: input, shape index: {}]   ;;  %s1036_s1 = inlined_call_operand.vmem [shape: f32[10,10], index: 1, kind: input, shape index: {}]   ;;  %s1037_s2 = inlined_call_operand.vmem [shape: f32[1,10], index: 2, kind: input, shape index: {}]   ;;  %s1038_s3 = inlined_call_operand.hbm [shape: f32[1,256], index: 3, kind: output, shape index: {}]  }
   0x1   :  { %10 = vsyncpa [#allocation3 + $0x1], 0  ;;  %s860_s12 = smov 0   ;;  %s862_s13 = smov 0  }
   0x2   :  { %s864_s14 = smov 0   ;;  %s866_s15 = smov 0  }
   0x3 LB: > { %s592_s16 = sadd.s32 4294967295, %s835_s15   ;;  %s593_s17 = sadd.s32 4294967294, %s835_s15   ;;  %s835_s15 = sphi %s866_s15, %s1044_s15   ;;  %s831_s14 = sphi %s864_s14, %s1043_s14   ;;  %s827_s13 = sphi %s862_s13, %s1042_s13   ;;  %s823_s12 = sphi %s860_s12, %s1041_s12  }
   0x4   : > { %s883_s18 = sadd.s32 1, %s835_s15   ;;  %s91_s19 = sadd.s32 1, %s831_s14 }
   0x5   : > { %s88_s20 = ssub.s32 %s835_s15, %s883_s18  ;;  %p101_p0 = scmp.ne.s32.totalorder %s831_s14, %s827_s13 }
   0x6   : > { %p89_p1 = scmp.eq.s32.totalorder %s88_s20, 0  ;;  %p102_p2 = scmp.eq.s32.totalorder %s592_s16, 1 }
   0x7   : > { %p107_p3 = scmp.ne.s32.totalorder %s827_s13, %s823_s12  ;;  %p108_p4 = scmp.eq.s32.totalorder %s593_s17, 1 }
   0x8   : > { %s893_s21 = scalar_select %p89_p1, %s831_s14, %s91_s19  }
   0x9   : > { %p895_p5 = por %p102_p2, %p101_p0  ;;  %p899_p6 = por %p108_p4, %p107_p3 }
   0xa   : > { %p596_p7 = scmp.ge.s32.totalorder %s835_s15, 1  ;;  %p141_p8 = scmp.lt.s32.totalorder %s835_s15, 3 }
   0xc   : > { %p142_p9 = pnand %p596_p7, %p141_p8 }
   0xd   : > { %s911_s28 = sshll.u32 (!%p142_p9), %s592_s16, 4  ;;  %s162_s9 = sand.u32 (!%p142_p9), 1, %s827_s13  }
   0xe   : > { %145 = sbr.rel (%p142_p9) target bundleno = 518 (0x206), region = 32  ;;  %p165_p10 = scmp.lt.s32.totalorder (!%p142_p9), %s911_s28, 31 }
   0xf   : > { %s163_s10 = scalar_lea.vmem (!%p142_p9), [#allocation2], %s162_s9  ;;  %s996_s19 = scalar_lea.hbm (!%p142_p9), %s1038_s3, %s911_s28 }
  0x10   : > { %s538_s11 = sshll.u32 (!%p142_p9), %s163_s10, 4  ;;  %s526_s20 = scalar_lea.sflag (!%p142_p9), [#allocation3], %s162_s9  ;;  %s990_s11 = int_to_ptr.vmem [resolvable:$true] %s538_s11 }
  0x11   : > { %s775_s24 = scalar_lea.vmem (!%p142_p9), %s990_s11, 16  ;;  %s839_s25 = smov (!%p142_p9), [#allocation2]  }
  0x12   : > { %p776_p11 = scmp.ne.s32.totalorder (!%p142_p9), %s990_s11, %s775_s24  ;;  %s779_s26 = sshll.u32 (!%p142_p9), %s839_s25, 4  ;;  %s780_s26 = int_to_ptr.vmem [resolvable:$false] %s779_s26 }
  0x13   : > { %v187_v0 = vld [vmem:[%s1036_s1 + $0x8] sm:$0x3]  ;;  %vm237_vm0 = vcmask 1041408   ;;  %v186_v1 = vld [vmem:[%s1036_s1] sm:$0xff]  ;;  %s166_s29 = scalar_select %p165_p10, %s911_s28, 31  ;;  %vm188_vm1 = vcmask 80896  }
  0x14   : > { %671 = vmatprep.subr.msk.mxu0 %vm237_vm0, %v187_v0  ;;  %v837_v18 = vmov 0.0   ;;  %vm838_vm2 = vmmov 0   ;;  %v402_v51 = vld [vmem:[%s1037_s2] sm:$0x1]  ;;  %p777_p12 = pnand %p776_p11, %p895_p5  ;;  %s781_s27 = scalar_lea.vmem %s780_s26, 32 }
  0x15   : > { %672 = vmatpush3.msk.msra.mxu0 %vm237_vm0, %v187_v0  ;;  %s598_s30 = sshll.u32 %s166_s29, 3  ;;  %699 = vmatprep.subr.mxu1 %v837_v18  ;;  %p782_p0 = scmp.lt.s32.totalorder %s990_s11, %s780_s26 }
  0x16   : > { %673 = vmatprep.subr.mxu0 %v186_v1  ;;  %s918_s6 = scalar_lea.vmem %s1035_s0, %s598_s30  ;;  %731 = vmatprep.mubr.msk.f32.mxu1 %vm838_vm2, %v837_v18  ;;  %p778_p13 = pneg %p777_p12 }
  0x17   : > { %674 = vmatpush3.msra.mxu0 %v186_v1  ;;  %v170_v2 = vld [vmem:[%s918_s6] sm:$0xff]  ;;  %v171_v3 = vld [vmem:[%s918_s6 + $0x8] sm:$0xff]  ;;  %v172_v4 = vld [vmem:[%s918_s6 + $0x10] sm:$0xff]  ;;  %p783_p1 = scmp.lt.s32.totalorder %s781_s27, %s775_s24 }
  0x18   : > { %675 = vmatprep.mubr.msk.f32.mxu0 %vm188_vm1, %v170_v2  ;;  %v173_v5 = vld [vmem:[%s918_s6 + $0x18] sm:$0xff]  ;;  %v174_v6 = vld [vmem:[%s918_s6 + $0x20] sm:$0xff]  ;;  %v175_v7 = vld [vmem:[%s918_s6 + $0x28] sm:$0xff] }
  0x19   : > { %676 = vmatmul.mubr.msk.f32.vlgmr.msra.gmra.mxu0 %vm188_vm1, %v171_v3  ;;  %v176_v8 = vld [vmem:[%s918_s6 + $0x30] sm:$0xff]  ;;  %v177_v9 = vld [vmem:[%s918_s6 + $0x38] sm:$0xff]  ;;  %v178_v10 = vld [vmem:[%s918_s6 + $0x40] sm:$0xff]  ;;  %p784_p2 = por %p783_p1, %p782_p0 }
  0x1a   : > { %678 = vmatprep.mubr.msk.f32.mxu0 %vm188_vm1, %v172_v4  ;;  %v179_v11 = vld [vmem:[%s918_s6 + $0x48] sm:$0xff]  ;;  %v180_v12 = vld [vmem:[%s918_s6 + $0x50] sm:$0xff]  ;;  %v181_v13 = vld [vmem:[%s918_s6 + $0x58] sm:$0xff] }
  0x1b   : > { %v182_v14 = vld [vmem:[%s918_s6 + $0x60] sm:$0xff]  ;;  %v183_v15 = vld [vmem:[%s918_s6 + $0x68] sm:$0xff]  ;;  %v184_v16 = vld [vmem:[%s918_s6 + $0x70] sm:$0xff]  ;;  %p785_p3 = pnand %p784_p2, %p778_p13 }
  0x1c   : > { %v185_v17 = vld [vmem:[%s918_s6 + $0x78] sm:$0xff] }
  0x1d   : > { %679 = vmatmul.mubr.msk.f32.gmra.mxu0 %vm188_vm1, %v173_v5 }
  0x1e   : > { %681 = vmatprep.mubr.msk.f32.mxu0 %vm188_vm1, %v174_v6 }
  0x21   : > { %682 = vmatmul.mubr.msk.f32.gmra.mxu0 %vm188_vm1, %v175_v7 }
  0x22   : > { %684 = vmatprep.mubr.msk.f32.mxu0 %vm188_vm1, %v176_v8 }
  0x25   : > { %685 = vmatmul.mubr.msk.f32.gmra.mxu0 %vm188_vm1, %v177_v9 }
  0x26   : > { %687 = vmatprep.mubr.msk.f32.mxu0 %vm188_vm1, %v178_v10 }
  0x29   : > { %688 = vmatmul.mubr.msk.f32.gmra.mxu0 %vm188_vm1, %v179_v11 }
  0x2a   : > { %690 = vmatprep.mubr.msk.f32.mxu0 %vm188_vm1, %v180_v12 }
  0x2d   : > { %691 = vmatmul.mubr.msk.f32.gmra.mxu0 %vm188_vm1, %v181_v13 }
  0x2e   : > { %693 = vmatprep.mubr.msk.f32.mxu0 %vm188_vm1, %v182_v14 }
  0x31   : > { %694 = vmatmul.mubr.msk.f32.gmra.mxu0 %vm188_vm1, %v183_v15 }
  0x32   : > { %696 = vmatprep.mubr.msk.f32.mxu0 %vm188_vm1, %v184_v16 }
  0x35   : > { %697 = vmatmul.mubr.msk.f32.gmra.mxu0 %vm188_vm1, %v185_v17 }
  0xd9   : > { %v677_v19 = vpop.f32.mrf.mxu0 }
  0xda   : > { %v387_v49 = vmax.f32 %v677_v19, 0.0 }
  0xdb   : > { %v307_v20 = vpop.f32.mrf.mxu0 }
  0xdc   : > { %v386_v50 = vmax.f32 %v307_v20, 0.0 }
  0xdd   : > { %v680_v21 = vpop.f32.mrf.mxu0 }
  0xde   : > { %v389_v47 = vmax.f32 %v680_v21, 0.0 }
  0xdf   : > { %v317_v22 = vpop.f32.mrf.mxu0 }
  0xe0   : > { %v388_v48 = vmax.f32 %v317_v22, 0.0 }
  0xe1   : > { %v683_v23 = vpop.f32.mrf.mxu0 }
  0xe2   : > { %v391_v45 = vmax.f32 %v683_v23, 0.0 }
  0xe3   : > { %v327_v24 = vpop.f32.mrf.mxu0 }
  0xe4   : > { %v390_v46 = vmax.f32 %v327_v24, 0.0 }
  0xe5   : > { %v686_v25 = vpop.f32.mrf.mxu0 }
  0xe6   : > { %v393_v43 = vmax.f32 %v686_v25, 0.0 }
  0xe7   : > { %v337_v26 = vpop.f32.mrf.mxu0 }
  0xe8   : > { %v392_v44 = vmax.f32 %v337_v26, 0.0 }
  0xe9   : > { %v689_v27 = vpop.f32.mrf.mxu0 }
  0xea   : > { %v395_v41 = vmax.f32 %v689_v27, 0.0 }
  0xeb   : > { %v347_v28 = vpop.f32.mrf.mxu0 }
  0xec   : > { %v394_v42 = vmax.f32 %v347_v28, 0.0 }
  0xed   : > { %v692_v29 = vpop.f32.mrf.mxu0 }
  0xee   : > { %v397_v39 = vmax.f32 %v692_v29, 0.0 }
  0xef   : > { %v357_v30 = vpop.f32.mrf.mxu0 }
  0xf0   : > { %v396_v40 = vmax.f32 %v357_v30, 0.0 }
  0xf1   : > { %v695_v31 = vpop.f32.mrf.mxu0 }
  0xf2   : > { %v399_v37 = vmax.f32 %v695_v31, 0.0 }
  0xf3   : > { %v367_v32 = vpop.f32.mrf.mxu0 }
  0xf4   : > { %v398_v38 = vmax.f32 %v367_v32, 0.0 }
  0xf5   : > { %v698_v33 = vpop.f32.mrf.mxu0 }
  0xf6   : > { %v401_v34 = vmax.f32 %v698_v33, 0.0 }
  0xf7   : > { %v377_v35 = vpop.f32.mrf.mxu0 }
  0xf8   : > { %700 = vmatpush3.xpose.msk.msra.mxu1 %vm188_vm1, %v401_v34  ;;  %v400_v36 = vmax.f32 %v377_v35, 0.0 }
  0xf9   : > { %701 = vmatprep.subr.mxu1 %v837_v18 }
  0xfc   : > { %702 = vmatpush3.xpose.msk.msra.mxu1 %vm188_vm1, %v400_v36 }
  0xfd   : > { %703 = vmatprep.subr.mxu1 %v837_v18 }
 0x100   : > { %704 = vmatpush3.xpose.msk.msra.mxu1 %vm188_vm1, %v399_v37 }
 0x101   : > { %705 = vmatprep.subr.mxu1 %v837_v18 }
 0x104   : > { %706 = vmatpush3.xpose.msk.msra.mxu1 %vm188_vm1, %v398_v38 }
 0x105   : > { %707 = vmatprep.subr.mxu1 %v837_v18 }
 0x108   : > { %708 = vmatpush3.xpose.msk.msra.mxu1 %vm188_vm1, %v397_v39 }
 0x109   : > { %709 = vmatprep.subr.mxu1 %v837_v18 }
 0x10c   : > { %710 = vmatpush3.xpose.msk.msra.mxu1 %vm188_vm1, %v396_v40 }
 0x10d   : > { %711 = vmatprep.subr.mxu1 %v837_v18 }
 0x110   : > { %712 = vmatpush3.xpose.msk.msra.mxu1 %vm188_vm1, %v395_v41 }
 0x111   : > { %713 = vmatprep.subr.mxu1 %v837_v18 }
 0x114   : > { %714 = vmatpush3.xpose.msk.msra.mxu1 %vm188_vm1, %v394_v42 }
 0x115   : > { %715 = vmatprep.subr.mxu1 %v837_v18 }
 0x118   : > { %716 = vmatpush3.xpose.msk.msra.mxu1 %vm188_vm1, %v393_v43 }
 0x119   : > { %717 = vmatprep.subr.mxu1 %v837_v18 }
 0x11c   : > { %718 = vmatpush3.xpose.msk.msra.mxu1 %vm188_vm1, %v392_v44 }
 0x11d   : > { %719 = vmatprep.subr.mxu1 %v837_v18 }
 0x120   : > { %720 = vmatpush3.xpose.msk.msra.mxu1 %vm188_vm1, %v391_v45 }
 0x121   : > { %721 = vmatprep.subr.mxu1 %v837_v18 }
 0x124   : > { %722 = vmatpush3.xpose.msk.msra.mxu1 %vm188_vm1, %v390_v46 }
 0x125   : > { %723 = vmatprep.subr.mxu1 %v837_v18 }
 0x128   : > { %724 = vmatpush3.xpose.msk.msra.mxu1 %vm188_vm1, %v389_v47 }
 0x129   : > { %725 = vmatprep.subr.mxu1 %v837_v18 }
 0x12c   : > { %726 = vmatpush3.xpose.msk.msra.mxu1 %vm188_vm1, %v388_v48 }
 0x12d   : > { %727 = vmatprep.subr.mxu1 %v837_v18 }
 0x130   : > { %728 = vmatpush3.xpose.msk.msra.mxu1 %vm188_vm1, %v387_v49 }
 0x131   : > { %729 = vmatprep.subr.mxu1 %v837_v18 }
 0x134   : > { %730 = vmatpush3.xpose.msk.msra.mxu1 %vm188_vm1, %v386_v50 }
 0x137   : > { %732 = vmatmul.mubr.msk.f32.vlgmr.msra.gmra.mxu1 %vm188_vm1, %v402_v51 }
 0x1f7   : > { %v520_v52 = vpop.f32.mrf.mxu1 }
 0x1f8   : > { %524 = vst [vmem:[%s163_s10] sm:$0x1] %v520_v52 }
 0x1f9   : > { %v733_v53 = vpop.f32.mrf.mxu1 }
 0x1fa   : > { %788 = shalt.err (!%p785_p3)
}
 0x1fb   : > { %s789_s28 = scalar_lea.hbm %s996_s19, 16  ;;  %s793_s4 = scalar_lea.hbm %s1038_s3, 32 }
 0x1fc   : > { %p790_p4 = scmp.ne.s32.totalorder %s996_s19, %s789_s28  ;;  %p794_p9 = scmp.lt.s32.totalorder %s996_s19, %s1038_s3 }
 0x1fd   : > { %p795_p10 = scmp.lt.s32.totalorder %s793_s4, %s789_s28 }
 0x1fe   : > { %p791_p7 = pnand %p790_p4, %p895_p5 }
 0x1ff   : > { %p796_p11 = por %p795_p10, %p794_p9 }
 0x200   : > { %p792_p8 = pneg %p791_p7 }
 0x202   : > { %p797_p12 = pnand %p796_p11, %p792_p8 }
 0x204   : > { %800 = shalt.err (!%p797_p12)
}
 0x205   : > { %734 = dma.vmem_to_hbm [thread:$0]  (%p895_p5), %s990_s11, 16, %s996_s19, %s526_s20  }
 0x206 PF: > { %p740_p13 = scmp.ge.s32.totalorder %s835_s15, 2  ;;  %s550_s7 = sand.u32 1, %s823_s12  }
 0x207   : > { %s551_s8 = scalar_lea.sflag [#allocation3], %s550_s7 }
 0x208   : > { %p737_p0 = pnand %p740_p13, %p899_p6 }
 0x20a   : > { %p738_p1 = pneg %p737_p0 }
 0x20c   : > { %818 = dma.done.wait (%p738_p1), %s551_s8, 16  }
 0x20d   : > { %820 = vsyncadd (%p738_p1), %s551_s8, 4294967280  ;;  %p13_p2 = scmp.ge.s32.totalorder %s883_s18, 4   ;;  %s1041_s12 = smov %s827_s13 }
 0x20e   : > { %s1042_s13 = smov %s831_s14  ;;  %s1043_s14 = smov %s893_s21 }
 0x20f   : > { %s1044_s15 = smov %s883_s18  ;;  %15 = sbr.rel (!%p13_p2) target bundleno = 3 (0x3), region = 67 }
 0x214   :  { %555 = vsyncpa [#allocation3], 1 }
 0x215   :  { %557 = vsyncpa [#allocation3 + $0x1], 1 }

</bundles_post_ra>
